<compile_context>
chip_gen: v7x
topology: tpu7x:2x2x1
jax: 0.10.0
libtpu: 0.0.40
codegen_flags: <defaults>
</compile_context>

<pallas_src>
import functools

import jax
import jax.numpy as jnp
from jax.experimental import pallas as pl
from jax.experimental.pallas import tpu as pltpu

_EPS = 1e-8


def _align_up(n, a):
    return ((n + a - 1) // a) * a


def _pick_tile(extent, align, cap_elems):
    """Tile size along one dim.

    Returns `extent` itself when extent <= align (full-extent blocks are
    always legal).  Otherwise returns a multiple of `align`, bounded by
    `cap_elems` (and by the aligned-up extent), preferring exact divisors of
    `extent` so no grid step is a partially-masked boundary block.
    """
    if extent <= align:
        return extent
    cap = max(align, min(cap_elems, _align_up(extent, align)))
    if extent % align == 0:
        best = align
        d = align
        limit = min(cap, extent)
        while d <= limit:
            if extent % d == 0:
                best = d
            d += align
        return best
    return max(align, (cap // align) * align)


@functools.lru_cache(maxsize=1)
def _chip_config():
    """Per-generation (block_byte_budget, vmem_limit_bytes, multi_tc)."""
    kind = ""
    try:
        kind = jax.devices()[0].device_kind.lower()
    except Exception:
        pass
    is_v7 = "7" in kind  # v7x: 64 MiB VMEM, 2 TensorCores per chip
    vmem_cap = (64 if is_v7 else 128) * 1024 * 1024
    try:
        info = pltpu.get_tpu_info()
        cap = getattr(info, "vmem_capacity_bytes", None)
        if cap:
            vmem_cap = int(cap)
    except Exception:
        pass
    multi_tc = is_v7
    # One block budget such that (in + out) x double-buffering = 4 resident
    # blocks stays well under the physical capacity on every generation:
    # v5e/v6e -> 16 MiB blocks (64 MiB peak of 128), v7x -> 8 MiB (32 of 64).
    block_budget = min(vmem_cap // 8, 16 * 1024 * 1024)
    vmem_limit = int(min(vmem_cap * 3 // 4, block_budget * 5 + (4 << 20)))
    return block_budget, vmem_limit, multi_tc


# ---------------------------------------------------------------------------
# Kernels
# ---------------------------------------------------------------------------

def _copy_kernel(a_ref, o_ref):
    # normalize=False: pure clone of the parameter tile.
    o_ref[...] = a_ref[...]


def _norm_fused_kernel(a_ref, o_ref):
    # normalize=True, full-T block: x / (max(|x|, -1, keepdims) + eps).
    # Index the ref twice (reduce, then scale) instead of binding one
    # whole-block value -> no second full-block temporary live across the
    # reduce at large (8-16 MiB) block sizes.
    m = jnp.max(jnp.abs(a_ref[...]), axis=-1, keepdims=True).astype(jnp.float32)
    inv = 1.0 / (m + _EPS)  # exact; per-row column, invisible vs. HBM traffic
    o_ref[...] = (a_ref[...].astype(jnp.float32) * inv).astype(o_ref.dtype)


def _make_rowmax_kernel(t_total, t_tile):
    """Pass 1 of the two-pass normalize: running per-row max of |x|."""
    ragged = (t_total % t_tile) != 0

    def kernel(a_ref, m_ref):
        @pl.when(pl.program_id(1) == 0)
        def _():
            m_ref[...] = jnp.zeros_like(m_ref)

        x = jnp.abs(a_ref[...]).astype(jnp.float32)
        if ragged:
            # The last T tile extends past the array; its out-of-bounds lanes
            # hold unspecified data, so mask them out of the running max.
            lane = jax.lax.broadcasted_iota(jnp.int32, x.shape, 1)
            valid = (pl.program_id(1) * t_tile + lane) < t_total
            x = jnp.where(valid, x, 0.0)
        part = jnp.max(x, axis=-1, keepdims=True)
        m_ref[...] = jnp.maximum(m_ref[...], part)

    return kernel


def _scale_kernel(a_ref, m_ref, o_ref):
    # Pass 2: elementwise x * 1/(max + eps), broadcasting the per-row max.
    inv = 1.0 / (m_ref[...] + _EPS)
    o_ref[...] = (a_ref[...].astype(jnp.float32) * inv).astype(o_ref.dtype)


# ---------------------------------------------------------------------------
# pallas_call wrappers
# ---------------------------------------------------------------------------

def _compiler_params(sem, vmem_limit):
    return pltpu.CompilerParams(
        dimension_semantics=sem,
        vmem_limit_bytes=vmem_limit,
    )


def _copy_2d(x2d, row_tile, t_tile, vmem_limit):
    rows, t = x2d.shape
    # NOTE: if xprof ever shows exposed DMA at step boundaries here, deepen
    # the input pipeline with pipeline_mode=pl.Buffered(3) and re-check VMEM.
    return pl.pallas_call(
        _copy_kernel,
        out_shape=jax.ShapeDtypeStruct((rows, t), x2d.dtype),
        grid_spec=pltpu.PrefetchScalarGridSpec(
            num_scalar_prefetch=0,
            grid=(pl.cdiv(rows, row_tile), pl.cdiv(t, t_tile)),
            in_specs=[pl.BlockSpec((row_tile, t_tile), lambda i, j: (i, j))],
            out_specs=pl.BlockSpec((row_tile, t_tile), lambda i, j: (i, j)),
        ),
        compiler_params=_compiler_params(("parallel", "parallel"), vmem_limit),
    )(x2d)


def _norm_fused(x2d, row_tile, vmem_limit):
    rows, t = x2d.shape
    return pl.pallas_call(
        _norm_fused_kernel,
        out_shape=jax.ShapeDtypeStruct((rows, t), x2d.dtype),
        grid_spec=pltpu.PrefetchScalarGridSpec(
            num_scalar_prefetch=0,
            grid=(pl.cdiv(rows, row_tile),),
            in_specs=[pl.BlockSpec((row_tile, t), lambda i: (i, 0))],
            out_specs=pl.BlockSpec((row_tile, t), lambda i: (i, 0)),
        ),
        compiler_params=_compiler_params(("parallel",), vmem_limit),
    )(x2d)


def _row_absmax(x2d, row_tile, t_tile, vmem_limit):
    rows, t = x2d.shape
    return pl.pallas_call(
        _make_rowmax_kernel(t, t_tile),
        out_shape=jax.ShapeDtypeStruct((rows, 1), jnp.float32),
        grid_spec=pltpu.PrefetchScalarGridSpec(
            num_scalar_prefetch=0,
            grid=(pl.cdiv(rows, row_tile), pl.cdiv(t, t_tile)),
            in_specs=[pl.BlockSpec((row_tile, t_tile), lambda i, k: (i, k))],
            out_specs=pl.BlockSpec((row_tile, 1), lambda i, k: (i, 0)),
        ),
        compiler_params=_compiler_params(("parallel", "arbitrary"), vmem_limit),
    )(x2d)


def _scale_rows(x2d, row_max, row_tile, t_tile, vmem_limit):
    rows, t = x2d.shape
    return pl.pallas_call(
        _scale_kernel,
        out_shape=jax.ShapeDtypeStruct((rows, t), x2d.dtype),
        grid_spec=pltpu.PrefetchScalarGridSpec(
            num_scalar_prefetch=0,
            grid=(pl.cdiv(rows, row_tile), pl.cdiv(t, t_tile)),
            in_specs=[pl.BlockSpec((row_tile, t_tile), lambda i, j: (i, j)),
                      pl.BlockSpec((row_tile, 1), lambda i, j: (i, 0))],
            out_specs=pl.BlockSpec((row_tile, t_tile), lambda i, j: (i, j)),
        ),
        compiler_params=_compiler_params(("parallel", "parallel"), vmem_limit),
    )(x2d, row_max)


# ---------------------------------------------------------------------------
# Forward
# ---------------------------------------------------------------------------

def _forward(audio, normalize, block_byte_budget=None):
    block_budget, vmem_limit, multi_tc = _chip_config()
    if block_byte_budget is not None:
        block_budget = block_byte_budget

    shape = audio.shape
    t = shape[-1]
    rows = 1
    for d in shape[:-1]:
        rows *= d
    x2d = audio.reshape(rows, t)

    itemsize = x2d.dtype.itemsize
    budget_elems = max(8 * 128, block_budget // itemsize)

    row_base = min(rows, 8)  # smallest legal row-block height
    row_cap_total = _align_up(rows, 8)

    if normalize and row_base * t <= budget_elems:
        # Fused single pass over full-extent-T blocks (legal for any T).
        cap_rows = max(row_base, budget_elems // t)
        if rows <= 8 or rows % 8 == 0:
            row_tile = _pick_tile(rows, 8, cap_rows)
        elif rows * t <= budget_elems:
            row_tile = rows                                 # full-extent rows
        else:
            row_tile = min(max(8, (cap_rows // 8) * 8), row_cap_total)
        grid_rows = pl.cdiv(rows, row_tile)
        if multi_tc and grid_rows == 1 and rows == row_tile and row_tile % 16 == 0:
            row_tile //= 2                     # >=2 steps -> both v7x TCs busy
        out2d = _norm_fused(x2d, row_tile, vmem_limit)
    else:
        # Lane-dense 2D tiling over (rows, T).
        if row_base * t <= budget_elems:
            t_tile = t                         # full-extent T: legal for any T
        else:
            t_tile = _pick_tile(t, 128, max(128, budget_elems // row_base))

        cap_rows = max(row_base, budget_elems // t_tile)
        if rows <= 8 or rows % 8 == 0:
            row_tile = _pick_tile(rows, 8, cap_rows)
        elif rows * t_tile <= budget_elems:
            row_tile = rows
        else:
            row_tile = min(max(8, (cap_rows // 8) * 8), row_cap_total)

        if (multi_tc and rows == row_tile and t == t_tile and t_tile % 256 == 0):
            t_tile //= 2        # single-step grid would idle one v7x TensorCore

        if normalize:
            row_max = _row_absmax(x2d, row_tile, t_tile, vmem_limit)
            out2d = _scale_rows(x2d, row_max, row_tile, t_tile, vmem_limit)
        else:
            out2d = _copy_2d(x2d, row_tile, t_tile, vmem_limit)

    return out2d.reshape(shape)


class OverfitRawAudio:
    """JAX/Pallas port of the PyTorch OverfitRawAudio module."""

    def __init__(self, shape, std=1.0, normalize=False, key=None):
        if key is None:
            key = jax.random.PRNGKey(0)
        # audio ~ N(0, std), same shape as the nn.Parameter.
        self.audio = std * jax.random.normal(key, tuple(shape), dtype=jnp.float32)
        self.normalize = normalize
        self.shape = tuple(shape)

    @property
    def as_numpy_array(self):
        import numpy as np
        return np.asarray(self.audio)

    def __call__(self, _, block_byte_budget=None):
        # The input is ignored, exactly like the PyTorch forward.
        return _forward(self.audio, self.normalize, block_byte_budget)


if __name__ == "__main__":
    key = jax.random.PRNGKey(0)
    k1, k2, k3, kin = jax.random.split(key, 4)

    def ref_max_norm(x):
        return x / (jnp.max(jnp.abs(x), axis=-1, keepdims=True) + _EPS)

    # Exact per-row reciprocal + multiply vs. the reference's divide can still
    # differ by ~1 ulp per element.
    TOL = dict(rtol=1e-5, atol=1e-6)

    # ---- A: normalize=True, fused full-T path (aligned T) ----
    shape_a = (2, 4, 1024)
    mod_a = OverfitRawAudio(shape_a, std=1.0, normalize=True, key=k1)
    dummy = jax.random.normal(kin, shape_a, dtype=jnp.float32)
    out_a = jax.block_until_ready(mod_a(dummy))
    assert out_a.shape == shape_a
    assert jnp.allclose(out_a, ref_max_norm(mod_a.audio), **TOL)

    # ---- B: normalize=False -> tiled copy, exact clone ----
    mod_b = OverfitRawAudio(shape_a, std=1.0, normalize=False, key=k1)
    out_b = jax.block_until_ready(mod_b(dummy))
    assert out_b.shape == shape_a
    assert jnp.array_equal(out_b, mod_b.audio)

    # ---- C: normalize=True, forced tiny budget -> two-pass tiled-T path ----
    out_c = jax.block_until_ready(mod_a(dummy, block_byte_budget=8 * 256 * 4))
    assert jnp.allclose(out_c, ref_max_norm(mod_a.audio), **TOL)

    # ---- D: unaligned rows (15), ragged T (1000) -> fused full-extent block,
    #         no pad / slice anywhere ----
    shape_d = (3, 5, 1000)
    mod_d = OverfitRawAudio(shape_d, std=0.5, normalize=True, key=k2)
    out_d = jax.block_until_ready(mod_d(jnp.zeros(shape_d, jnp.float32)))
    assert out_d.shape == shape_d
    assert jnp.allclose(out_d, ref_max_norm(mod_d.audio), **TOL)

    # ---- E: ragged T + tiny budget -> two-pass with masked boundary T tile ----
    out_e = jax.block_until_ready(
        mod_d(jnp.zeros(shape_d, jnp.float32), block_byte_budget=8 * 256 * 4))
    assert jnp.allclose(out_e, ref_max_norm(mod_d.audio), **TOL)

    # ---- F: ragged T + tiny budget, normalize=False -> boundary-masked copy ----
    mod_f = OverfitRawAudio(shape_d, std=0.5, normalize=False, key=k3)
    out_f = jax.block_until_ready(
        mod_f(jnp.zeros(shape_d, jnp.float32), block_byte_budget=8 * 256 * 4))
    assert jnp.array_equal(out_f, mod_f.audio)

    print("KERNEL_OK")
</pallas_src>

<mosaic_0001>
module attributes {stable_mosaic.version = 11 : i64} {
  func.func @_norm_fused_kernel(%arg0: i32, %arg1: memref<8x1024xf32, #tpu.memory_space<vmem>>, %arg2: memref<8x1024xf32, #tpu.memory_space<vmem>>) attributes {dimension_semantics = [#tpu.dimension_semantics<parallel>], iteration_bounds = array<i64: 1>, scalar_prefetch = 0 : i64, scratch_operands = 0 : i64, tpu.core_type = #tpu.core_type<tc>, window_params = [{transform_indices = @transform_0, window_bounds = array<i64: 8, 1024>}, {transform_indices = @transform_1, window_bounds = array<i64: 8, 1024>}]} {
    %c0 = arith.constant 0 : index
    %c0_0 = arith.constant 0 : index
    %0 = vector.load %arg1[%c0, %c0_0] : memref<8x1024xf32, #tpu.memory_space<vmem>>, vector<8x1024xf32>
    %1 = math.absf %0 : vector<8x1024xf32>
    %cst = arith.constant dense<0xFF800000> : vector<8xf32>
    %2 = vector.multi_reduction <maximumf>, %1, %cst [1] : vector<8x1024xf32> to vector<8xf32>
    %3 = vector.shape_cast %2 : vector<8xf32> to vector<8x1xf32>
    %cst_1 = arith.constant 9.99999993E-9 : f32
    %4 = vector.broadcast %cst_1 : f32 to vector<8x1xf32>
    %5 = arith.addf %3, %4 : vector<8x1xf32>
    %cst_2 = arith.constant 1.000000e+00 : f32
    %6 = vector.broadcast %cst_2 : f32 to vector<8x1xf32>
    %7 = arith.divf %6, %5 : vector<8x1xf32>
    %c0_3 = arith.constant 0 : index
    %c0_4 = arith.constant 0 : index
    %8 = vector.load %arg1[%c0_3, %c0_4] : memref<8x1024xf32, #tpu.memory_space<vmem>>, vector<8x1024xf32>
    %9 = vector.broadcast %7 : vector<8x1xf32> to vector<8x1024xf32>
    %10 = arith.mulf %8, %9 : vector<8x1024xf32>
    %c0_5 = arith.constant 0 : index
    %c0_6 = arith.constant 0 : index
    %11 = vector.load %arg2[%c0_5, %c0_6] : memref<8x1024xf32, #tpu.memory_space<vmem>>, vector<8x1024xf32>
    tpu.vector_store %arg2[%c0_5, %c0_6], %10 {strides = array<i32>} : memref<8x1024xf32, #tpu.memory_space<vmem>>, vector<8x1024xf32>,
    return
  }
  func.func @transform_0(%arg0: i32) -> (i32, i32) {
    %c0_i32 = arith.constant 0 : i32
    %c0_i32_0 = arith.constant 0 : i32
    return %arg0, %c0_i32 : i32, i32
  }
  func.func @transform_1(%arg0: i32) -> (i32, i32) {
    %c0_i32 = arith.constant 0 : i32
    %c0_i32_0 = arith.constant 0 : i32
    return %arg0, %c0_i32 : i32, i32
  }
}

</mosaic_0001>

<bundles_post_ra>
// kernel: tpu_custom_call.1
= control target key start
LH: loop header
LB: loop body
LE: loop exit
PB: predicated region body
PF: predicated region fallthrough
CT: control target
= control target key end

     0   :  { %6 = vsyncpa [#allocation3], 0  ;;  %s173_s0 = inlined_call_operand.hbm [shape: f32[8,1024], index: 0, kind: input, shape index: {}]   ;;  %s174_s1 = inlined_call_operand.hbm [shape: f32[8,1024], index: 1, kind: output, shape index: {}]  }
   0x1   :  { %7 = vsyncpa [#allocation4], 0  ;;  %s137_s6 = smov [#allocation2]   ;;  %s84_s10 = scalar_lea.hbm %s173_s0, 1024 }
   0x2   :  { %s14_s7 = sshll.u32 %s137_s6, 4  ;;  %p85_p0 = scmp.ne.s32.totalorder %s173_s0, %s84_s10  ;;  %s15_s7 = int_to_ptr.vmem [resolvable:$true] %s14_s7 }
   0x3   :  { %p88_p1 = scmp.lt.u32.totalorder %s84_s10, %s173_s0 }
   0x5   :  { %p90_p2 = pnand %p88_p1, %p85_p0 }
   0x7   :  { %93 = shalt.err (!%p90_p2)
}
   0x8   :  { %s94_s15 = scalar_lea.vmem %s15_s7, 1024  ;;  %p99_p4 = scmp.lt.s32.totalorder %s15_s7, %s15_s7 }
   0x9   :  { %p95_p3 = scmp.ne.s32.totalorder %s15_s7, %s94_s15  ;;  %p100_p5 = scmp.lt.s32.totalorder %s94_s15, %s94_s15 }
   0xb   :  { %p101_p6 = por %p100_p5, %p99_p4 }
   0xd   :  { %p102_p7 = pnand %p101_p6, %p95_p3 }
   0xf   :  { %105 = shalt.err (!%p102_p7)
}
  0x10   :  { %17 = dma.hbm_to_vmem [thread:$0]  %s173_s0, 1024, %s15_s7, [#allocation3]  }
  0x11   :  { %128 = dma.done.wait [#allocation3], 1024  }
  0x12   :  { %129 = vsyncadd [#allocation3], 4294966272  ;;  %v21_v0 = vld [vmem:[#allocation2] sm:$0xff]  ;;  %v22_v1 = vld [vmem:[#allocation2 + $0x8] sm:$0xff]  ;;  %s138_s0 = smov [#allocation5]  }
  0x13   :  { %v23_v2 = vld [vmem:[#allocation2 + $0x10] sm:$0xff]  ;;  %v24_v3 = vld [vmem:[#allocation2 + $0x18] sm:$0xff]  ;;  %v25_v4 = vld [vmem:[#allocation2 + $0x20] sm:$0xff]  ;;  %s71_s18 = sshll.u32 %s138_s0, 4  ;;  %s72_s18 = int_to_ptr.vmem [resolvable:$true] %s71_s18 }
  0x14   :  { %v26_v5 = vld [vmem:[#allocation2 + $0x28] sm:$0xff]  ;;  %v27_v6 = vld [vmem:[#allocation2 + $0x30] sm:$0xff]  ;;  %v28_v7 = vld [vmem:[#allocation2 + $0x38] sm:$0xff]  ;;  %132 = vmaxabs.init.f32.vacc0 %v21_v0, %v25_v4  ;;  %s106_s19 = scalar_lea.vmem %s72_s18, 1024  ;;  %p111_p9 = scmp.lt.s32.totalorder %s72_s18, %s72_s18 }
  0x15   :  { %p107_p8 = scmp.ne.s32.totalorder %s72_s18, %s106_s19  ;;  %p112_p10 = scmp.lt.s32.totalorder %s106_s19, %s106_s19 }
  0x16   :  { %133 = vmaxabs.f32.vacc0 %v22_v1, %v26_v5 }
  0x17   :  { %p113_p11 = por %p112_p10, %p111_p9 }
  0x18   :  { %134 = vmaxabs.f32.vacc0 %v23_v2, %v27_v6 }
  0x19   :  { %p114_p12 = pnand %p113_p11, %p107_p8 }
  0x1a   :  { %135 = vmaxabs.f32.vacc0 %v24_v3, %v28_v7 }
  0x1c   :  { %v136_v8 = vmovacc.low.even.vacc0 }
  0x1e   :  { %44 = vmax.xlane.f32.xlu0 %v136_v8 }
  0xab   :  { %v45_v9 = vpop.xlane.xlu0 %44 }
  0xac   :  { %v46_v10 = vadd.f32 1e-08, %v45_v9 }
  0xae   :  { %82 = vrcp.f32 %v46_v10 }
  0xb8   :  { %v83_v11 = vpop.eup %82 }
  0xb9   :  { %v49_v12 = vmul.f32 %v83_v11, %v21_v0  ;;  %v50_v13 = vmul.f32 %v83_v11, %v22_v1  ;;  %v51_v14 = vmul.f32 %v83_v11, %v23_v2  ;;  %v52_v15 = vmul.f32 %v83_v11, %v24_v3 }
  0xba   :  { %v53_v16 = vmul.f32 %v83_v11, %v25_v4  ;;  %v54_v17 = vmul.f32 %v83_v11, %v26_v5  ;;  %v55_v18 = vmul.f32 %v83_v11, %v27_v6  ;;  %v56_v19 = vmul.f32 %v83_v11, %v28_v7 }
  0xbb   :  { %57 = vst [vmem:[#allocation5] sm:$0xff] %v49_v12  ;;  %58 = vst [vmem:[#allocation5 + $0x8] sm:$0xff] %v50_v13 }
  0xbc   :  { %59 = vst [vmem:[#allocation5 + $0x10] sm:$0xff] %v51_v14  ;;  %60 = vst [vmem:[#allocation5 + $0x18] sm:$0xff] %v52_v15 }
  0xbd   :  { %61 = vst [vmem:[#allocation5 + $0x20] sm:$0xff] %v53_v16  ;;  %62 = vst [vmem:[#allocation5 + $0x28] sm:$0xff] %v54_v17 }
  0xbe   :  { %63 = vst [vmem:[#allocation5 + $0x30] sm:$0xff] %v55_v18  ;;  %64 = vst [vmem:[#allocation5 + $0x38] sm:$0xff] %v56_v19 }
  0xbf   :  { %117 = shalt.err (!%p114_p12)
}
  0xc0   :  { %s118_s22 = scalar_lea.hbm %s174_s1, 1024 }
  0xc1   :  { %p119_p13 = scmp.ne.s32.totalorder %s174_s1, %s118_s22  ;;  %p122_p0 = scmp.lt.u32.totalorder %s118_s22, %s174_s1 }
  0xc3   :  { %p124_p1 = pnand %p122_p0, %p119_p13 }
  0xc5   :  { %127 = shalt.err (!%p124_p1)
}
  0xc6   :  { %74 = dma.vmem_to_hbm [thread:$0]  %s72_s18, 1024, %s174_s1, [#allocation4]  }
  0xc7   :  { %130 = dma.done.wait [#allocation4], 1024  }
  0xc8   :  { %131 = vsyncadd [#allocation4], 4294966272 }
  0xc9   :  { %78 = vsyncpa [#allocation3], 1 }
  0xca   :  { %79 = vsyncpa [#allocation4], 1 }

</bundles_post_ra>
